<compile_context>
chip_gen: v7x
topology: tpu7x:2x2x1
jax: 0.10.0
libtpu: 0.0.40
codegen_flags: <defaults>
</compile_context>

<pallas_src>
import math
import jax
import jax.numpy as jnp
from jax.experimental import pallas as pl
from jax.experimental.pallas import tpu as pltpu  # noqa: F401 (kept for parity with template)

D_MODEL = 32      # d_model
D_FF = 2048       # d_ff (module default)
BATCH = 2
SEQ = 8


def _ffn_kernel(x_ref, w1_ref, b1_ref, w2_ref, b2_ref, o_ref):
    # x_ref:  (N, D)   f32      w1_ref: (D, DFF) bf16    b1_ref: (1, DFF) f32
    # w2_ref: (DFF, D) bf16     b2_ref: (1, D)   f32     o_ref:  (N, D)   f32
    x = x_ref[...].astype(w1_ref.dtype)                      # bf16 MXU operand
    h = jnp.dot(x, w1_ref[...], preferred_element_type=jnp.float32) + b1_ref[...]
    h = jnp.maximum(h, 0.0)
    # TODO(synk): nn.Dropout omitted (eval-mode identity); training-mode parity
    #             would need a pltpu.prng_seed / pltpu.prng_random_bits keep-mask
    #             plus 1/(1-p) scaling.
    y = jnp.dot(h.astype(w2_ref.dtype), w2_ref[...],
                preferred_element_type=jnp.float32) + b2_ref[...]
    o_ref[...] = y.astype(o_ref.dtype)


def prepare_ffn_params(w1, b1, w2, b2, weight_dtype=jnp.bfloat16):
    """One-time parameter layout/cast (hoisted out of the hot path).

    Takes PyTorch nn.Linear layout (w1: (D_FF, D), w2: (D, D_FF)) and returns
    (in, out)-layout weights in `weight_dtype` plus 2-D f32 biases."""
    w1t = jnp.transpose(w1).astype(weight_dtype)     # (D, D_FF)
    w2t = jnp.transpose(w2).astype(weight_dtype)     # (D_FF, D)
    b1r = b1.reshape(1, -1).astype(jnp.float32)      # (1, D_FF)
    b2r = b2.reshape(1, -1).astype(jnp.float32)      # (1, D)
    return w1t, b1r, w2t, b2r


@jax.jit
def feed_forward(x, w1t, b1r, w2t, b2r):
    """x: (B, S, D) f32; (w1t, b1r, w2t, b2r) from prepare_ffn_params."""
    b, s, d = x.shape
    n = b * s
    d_ff = w1t.shape[1]

    x2d = x.reshape(n, d)

    def full_spec(arr):
        ndim = arr.ndim
        return pl.BlockSpec(arr.shape, lambda: (0,) * ndim)

    w_itemsize = jnp.dtype(w1t.dtype).itemsize
    cost = pl.CostEstimate(
        flops=4 * n * d * d_ff,                       # two (N,D)x(D,DFF)-sized matmuls
        transcendentals=0,
        bytes_accessed=(x2d.size * 4
                        + w1t.size * w_itemsize + b1r.size * 4
                        + w2t.size * w_itemsize + b2r.size * 4
                        + n * d * 4),
    )

    out2d = pl.pallas_call(
        _ffn_kernel,
        out_shape=jax.ShapeDtypeStruct((n, d), jnp.float32),
        in_specs=[full_spec(x2d), full_spec(w1t), full_spec(b1r),
                  full_spec(w2t), full_spec(b2r)],
        out_specs=pl.BlockSpec((n, d), lambda: (0, 0)),
        cost_estimate=cost,
        # No grid: weights are DMA'd exactly once per call; VMEM footprint
        # (~0.6 MiB incl. double buffers) fits v5e/v6e (128 MiB) and v7x (64 MiB).
    )(x2d, w1t, b1r, w2t, b2r)

    return out2d.reshape(b, s, d)


# ---------------- pure-JAX references ----------------
def _reference_f32(x, w1, b1, w2, b2):
    """Mirrors the PyTorch forward in eval mode, full f32."""
    h = jnp.maximum(jnp.einsum("bsd,fd->bsf", x, w1) + b1, 0.0)
    return jnp.einsum("bsf,df->bsd", h, w2) + b2


def _reference_matched(x, w1t, b1r, w2t, b2r):
    """Matched-precision reference (bf16 MXU operands, f32 accumulation)."""
    b, s, d = x.shape
    x2d = x.reshape(b * s, d).astype(w1t.dtype)
    h = jnp.dot(x2d, w1t, preferred_element_type=jnp.float32) + b1r
    h = jnp.maximum(h, 0.0)
    y = jnp.dot(h.astype(w2t.dtype), w2t, preferred_element_type=jnp.float32) + b2r
    return y.reshape(b, s, d)


if __name__ == "__main__":
    key = jax.random.PRNGKey(0)
    k1, k2, k3, k4, k5 = jax.random.split(key, 5)

    # nn.Linear default init: U(-1/sqrt(in_features), 1/sqrt(in_features))
    bound1 = 1.0 / math.sqrt(D_MODEL)
    w1 = jax.random.uniform(k1, (D_FF, D_MODEL), jnp.float32, -bound1, bound1)
    b1 = jax.random.uniform(k2, (D_FF,), jnp.float32, -bound1, bound1)

    bound2 = 1.0 / math.sqrt(D_FF)
    w2 = jax.random.uniform(k3, (D_MODEL, D_FF), jnp.float32, -bound2, bound2)
    b2 = jax.random.uniform(k4, (D_MODEL,), jnp.float32, -bound2, bound2)

    x = jax.random.normal(k5, (BATCH, SEQ, D_MODEL), jnp.float32)

    # One-time parameter preparation (transpose + bf16 cast) -- NOT in the hot path.
    w1t, b1r, w2t, b2r = prepare_ffn_params(w1, b1, w2, b2)
    w1t, b1r, w2t, b2r = jax.block_until_ready((w1t, b1r, w2t, b2r))

    out = feed_forward(x, w1t, b1r, w2t, b2r)
    out = jax.block_until_ready(out)

    # Exactness vs. a matched-precision (bf16 operand / f32 accumulate) reference.
    ref_matched = _reference_matched(x, w1t, b1r, w2t, b2r)
    # Module semantics vs. the full-f32 PyTorch-equivalent forward (bf16-weight
    # quantization error only; tolerance relaxed accordingly per review).
    ref_f32 = _reference_f32(x, w1, b1, w2, b2)

    assert out.shape == ref_f32.shape, "shape mismatch"
    assert jnp.allclose(out, ref_matched, rtol=1e-3, atol=1e-3), \
        "mismatch vs matched-precision reference"
    assert jnp.allclose(out, ref_f32, rtol=2e-2, atol=2e-2), \
        "mismatch vs f32 reference"

    print("KERNEL_OK")
</pallas_src>

<mosaic_0001>
module attributes {stable_mosaic.version = 11 : i64} {
  func.func @_ffn_kernel(%arg0: memref<16x32xf32, #tpu.memory_space<vmem>>, %arg1: memref<32x2048xbf16, #tpu.memory_space<vmem>>, %arg2: memref<1x2048xf32, #tpu.memory_space<vmem>>, %arg3: memref<2048x32xbf16, #tpu.memory_space<vmem>>, %arg4: memref<1x32xf32, #tpu.memory_space<vmem>>, %arg5: memref<16x32xf32, #tpu.memory_space<vmem>>) attributes {dimension_semantics = [], scalar_prefetch = 0 : i64, scratch_operands = 0 : i64, tpu.core_type = #tpu.core_type<tc>} {
    %c0 = arith.constant 0 : index
    %c0_0 = arith.constant 0 : index
    %0 = vector.load %arg0[%c0, %c0_0] : memref<16x32xf32, #tpu.memory_space<vmem>>, vector<16x32xf32>
    %1 = arith.truncf %0 : vector<16x32xf32> to vector<16x32xbf16>
    %c0_1 = arith.constant 0 : index
    %c0_2 = arith.constant 0 : index
    %2 = vector.load %arg1[%c0_1, %c0_2] : memref<32x2048xbf16, #tpu.memory_space<vmem>>, vector<32x2048xbf16>
    %cst = arith.constant dense<0.000000e+00> : vector<16x2048xf32>
    %3 = tpu.matmul %1, %2, %cst {dimension_numbers = #tpu.dot_dimension_numbers<[1], [0], [0], [1], [0, 0, 1, 1], [], []>} : vector<16x32xbf16>, vector<32x2048xbf16>, vector<16x2048xf32> -> vector<16x2048xf32>
    %c0_3 = arith.constant 0 : index
    %c0_4 = arith.constant 0 : index
    %4 = vector.load %arg2[%c0_3, %c0_4] : memref<1x2048xf32, #tpu.memory_space<vmem>>, vector<1x2048xf32>
    %5 = vector.broadcast %4 : vector<1x2048xf32> to vector<16x2048xf32>
    %6 = arith.addf %3, %5 : vector<16x2048xf32>
    %cst_5 = arith.constant 0.000000e+00 : f32
    %7 = vector.broadcast %cst_5 : f32 to vector<16x2048xf32>
    %8 = arith.maximumf %6, %7 : vector<16x2048xf32>
    %9 = arith.truncf %8 : vector<16x2048xf32> to vector<16x2048xbf16>
    %c0_6 = arith.constant 0 : index
    %c0_7 = arith.constant 0 : index
    %10 = vector.load %arg3[%c0_6, %c0_7] : memref<2048x32xbf16, #tpu.memory_space<vmem>>, vector<2048x32xbf16>
    %cst_8 = arith.constant dense<0.000000e+00> : vector<16x32xf32>
    %11 = tpu.matmul %9, %10, %cst_8 {dimension_numbers = #tpu.dot_dimension_numbers<[1], [0], [0], [1], [0, 0, 1, 1], [], []>} : vector<16x2048xbf16>, vector<2048x32xbf16>, vector<16x32xf32> -> vector<16x32xf32>
    %c0_9 = arith.constant 0 : index
    %c0_10 = arith.constant 0 : index
    %12 = vector.load %arg4[%c0_9, %c0_10] : memref<1x32xf32, #tpu.memory_space<vmem>>, vector<1x32xf32>
    %13 = vector.broadcast %12 : vector<1x32xf32> to vector<16x32xf32>
    %14 = arith.addf %11, %13 : vector<16x32xf32>
    %c0_11 = arith.constant 0 : index
    %c0_12 = arith.constant 0 : index
    %15 = vector.load %arg5[%c0_11, %c0_12] : memref<16x32xf32, #tpu.memory_space<vmem>>, vector<16x32xf32>
    tpu.vector_store %arg5[%c0_11, %c0_12], %14 {strides = array<i32>} : memref<16x32xf32, #tpu.memory_space<vmem>>, vector<16x32xf32>,
    return
  }
}

</mosaic_0001>

<bundles_post_ra>
// kernel: feed_forward.1
= control target key start
LH: loop header
LB: loop body
LE: loop exit
PB: predicated region body
PF: predicated region fallthrough
CT: control target
= control target key end

     0   :  { %v2575_v8 = vmov 0   ;;  %vm301_vm0 = vcmask 261120   ;;  %s3226_s0 = inlined_call_operand.vmem [shape: f32[16,32], index: 0, kind: input, shape index: {}]   ;;  %s3227_s1 = inlined_call_operand.vmem [shape: bf16[32,2048], index: 1, kind: input, shape index: {}]   ;;  %s3228_s2 = inlined_call_operand.vmem [shape: f32[1,2048], index: 2, kind: input, shape index: {}]   ;;  %s3229_s3 = inlined_call_operand.vmem [shape: bf16[2048,32], index: 3, kind: input, shape index: {}]   ;;  %s3230_s4 = inlined_call_operand.vmem [shape: f32[1,32], index: 4, kind: input, shape index: {}]   ;;  %s3231_s5 = inlined_call_operand.hbm [shape: f32[16,32], index: 5, kind: output, shape index: {}]  }
   0x1   :  { %v25_v0 = vld [vmem:[%s3227_s1] sm:$0xff]  ;;  %v26_v2 = vld [vmem:[%s3227_s1 + $0x8] sm:$0xff]  ;;  %337 = vmatprep.mubr.bf16.mxu0 %v2575_v8  ;;  %380 = vmatprep.mubr.bf16.mxu1 %v2575_v8  ;;  %v27_v16 = vld [vmem:[%s3227_s1 + $0x10] sm:$0xff] }
   0x2   :  { %v33_v1 = vld [vmem:[%s3227_s1 + $0x40] sm:$0xff]  ;;  %v34_v4 = vld [vmem:[%s3227_s1 + $0x48] sm:$0xff]  ;;  %v35_v17 = vld [vmem:[%s3227_s1 + $0x50] sm:$0xff] }
   0x3   :  { %v2075_v3 = vcombine.high %v25_v0, %v33_v1  ;;  %v2074_v5 = vcombine.low %v25_v0, %v33_v1  ;;  %v41_v6 = vld [vmem:[%s3227_s1 + $0x80] sm:$0xff]  ;;  %v2077_v9 = vcombine.high %v26_v2, %v34_v4  ;;  %v2076_v10 = vcombine.low %v26_v2, %v34_v4  ;;  %v42_v12 = vld [vmem:[%s3227_s1 + $0x88] sm:$0xff]  ;;  %v28_v20 = vld [vmem:[%s3227_s1 + $0x18] sm:$0xff] }
   0x4   :  { %v49_v7 = vld [vmem:[%s3227_s1 + $0xc0] sm:$0xff]  ;;  %v50_v13 = vld [vmem:[%s3227_s1 + $0xc8] sm:$0xff]  ;;  %v36_v21 = vld [vmem:[%s3227_s1 + $0x58] sm:$0xff]  ;;  %v2079_v23 = vcombine.high %v27_v16, %v35_v17  ;;  %v2078_v30 = vcombine.low %v27_v16, %v35_v17 }
   0x5   :  { %v2091_v11 = vcombine.high %v41_v6, %v49_v7  ;;  %305 = vmatprep.subr.bf16.mxu0 %v2075_v3  ;;  %v2093_v14 = vcombine.high %v42_v12, %v50_v13  ;;  %v22_v15 = vld [vmem:[%s3226_s0] sm:$0xff]  ;;  %348 = vmatprep.subr.bf16.mxu1 %v2077_v9  ;;  %v2090_v18 = vcombine.low %v41_v6, %v49_v7  ;;  %v23_v19 = vld [vmem:[%s3226_s0 + $0x8] sm:$0xff]  ;;  %v43_v25 = vld [vmem:[%s3227_s1 + $0x90] sm:$0xff] }
   0x6   :  { %306 = vmatpush1.bf16.msra.mxu0 %v2074_v5  ;;  %349 = vmatpush1.bf16.msra.mxu1 %v2076_v10  ;;  %v2092_v22 = vcombine.low %v42_v12, %v50_v13  ;;  %v2081_v24 = vcombine.high %v28_v20, %v36_v21  ;;  %v51_v26 = vld [vmem:[%s3227_s1 + $0xd0] sm:$0xff]  ;;  %v2659_v27 = vpack.c.bf16 %v23_v19, %v22_v15  ;;  %v44_v28 = vld [vmem:[%s3227_s1 + $0x98] sm:$0xff]  ;;  %v29_v34 = vld [vmem:[%s3227_s1 + $0x20] sm:$0xff] }
   0x7   :  { %307 = vmatprep.subr.bf16.mxu0 %v2091_v11  ;;  %350 = vmatprep.subr.bf16.mxu1 %v2093_v14  ;;  %v52_v29 = vld [vmem:[%s3227_s1 + $0xd8] sm:$0xff]  ;;  %v2080_v31 = vcombine.low %v28_v20, %v36_v21  ;;  %v2095_v32 = vcombine.high %v43_v25, %v51_v26  ;;  %v37_v35 = vld [vmem:[%s3227_s1 + $0x60] sm:$0xff]  ;;  %v30_v36 = vld [vmem:[%s3227_s1 + $0x28] sm:$0xff]  ;;  %v2094_v38 = vcombine.low %v43_v25, %v51_v26 }
   0x8   :  { %v2097_v33 = vcombine.high %v44_v28, %v52_v29  ;;  %v38_v37 = vld [vmem:[%s3227_s1 + $0x68] sm:$0xff]  ;;  %v45_v39 = vld [vmem:[%s3227_s1 + $0xa0] sm:$0xff]  ;;  %v2096_v40 = vcombine.low %v44_v28, %v52_v29  ;;  %v2083_v41 = vcombine.high %v29_v34, %v37_v35  ;;  %v2082_v46 = vcombine.low %v29_v34, %v37_v35  ;;  %v31_v47 = vld [vmem:[%s3227_s1 + $0x30] sm:$0xff] }
   0x9   :  { %v53_v42 = vld [vmem:[%s3227_s1 + $0xe0] sm:$0xff]  ;;  %v2085_v43 = vcombine.high %v30_v36, %v38_v37  ;;  %v46_v44 = vld [vmem:[%s3227_s1 + $0xa8] sm:$0xff]  ;;  %v2084_v48 = vcombine.low %v30_v36, %v38_v37  ;;  %v39_v50 = vld [vmem:[%s3227_s1 + $0x70] sm:$0xff] }
   0xa   :  { %308 = vmatpush1.bf16.msra.mxu0 %v2090_v18  ;;  %351 = vmatpush1.bf16.msra.mxu1 %v2092_v22  ;;  %v54_v45 = vld [vmem:[%s3227_s1 + $0xe8] sm:$0xff]  ;;  %v2099_v49 = vcombine.high %v45_v39, %v53_v42  ;;  %v32_v52 = vld [vmem:[%s3227_s1 + $0x38] sm:$0xff]  ;;  %v2098_v54 = vcombine.low %v45_v39, %v53_v42  ;;  %v47_v55 = vld [vmem:[%s3227_s1 + $0xb0] sm:$0xff]  ;;  %v2087_v57 = vcombine.high %v31_v47, %v39_v50 }
   0xb   :  { %391 = vmatprep.subr.bf16.mxu0 %v2079_v23  ;;  %434 = vmatprep.subr.bf16.mxu1 %v2081_v24  ;;  %v2101_v51 = vcombine.high %v46_v44, %v54_v45  ;;  %v40_v53 = vld [vmem:[%s3227_s1 + $0x78] sm:$0xff]  ;;  %v2100_v56 = vcombine.low %v46_v44, %v54_v45  ;;  %v55_v58 = vld [vmem:[%s3227_s1 + $0xf0] sm:$0xff]  ;;  %v2086_v62 = vcombine.low %v31_v47, %v39_v50  ;;  %v2423_v3 = vld [vmem:[%s3229_s3 + $0x40] sm:$0xff]  }
   0xc   :  { %v2089_v59 = vcombine.high %v32_v52, %v40_v53  ;;  %v48_v60 = vld [vmem:[%s3227_s1 + $0xb8] sm:$0xff]  ;;  %v2088_v63 = vcombine.low %v32_v52, %v40_v53  ;;  %v2103_v0 = vcombine.high %v47_v55, %v55_v58  ;;  %v2102_v2 = vcombine.low %v47_v55, %v55_v58  ;;  %v2424_v5 = vld [vmem:[%s3229_s3 + $0xc0] sm:$0xff]   ;;  %v2427_v9 = vld [vmem:[%s3229_s3 + $0x48] sm:$0xff]  }
   0xd   :  { %2106 = vmatmul.mubr.msk.bf16.vlgmr.msra.gmra.mrb[0].mxu0 %vm301_vm0, %v2659_v27  ;;  %2107 = vmatmul.mubr.msk.bf16.vlgmr.msra.gmra.mrb[0].mxu1 %vm301_vm0, %v2659_v27  ;;  %v56_v61 = vld [vmem:[%s3227_s1 + $0xf8] sm:$0xff]  ;;  %v2425_v6 = vld [vmem:[%s3229_s3] sm:$0xff]   ;;  %v2428_v10 = vld [vmem:[%s3229_s3 + $0xc8] sm:$0xff]  }
   0xe   :  { %392 = vmatpush1.bf16.msra.mxu0 %v2078_v30  ;;  %435 = vmatpush1.bf16.msra.mxu1 %v2080_v31  ;;  %v2105_v1 = vcombine.high %v48_v60, %v56_v61  ;;  %v2104_v4 = vcombine.low %v48_v60, %v56_v61  ;;  %v2426_v7 = vld [vmem:[%s3229_s3 + $0x80] sm:$0xff]   ;;  %v2430_v11 = vld [vmem:[%s3229_s3 + $0x88] sm:$0xff]   ;;  %v2431_v12 = vld [vmem:[%s3229_s3 + $0x50] sm:$0xff]  }
   0xf   :  { %393 = vmatprep.subr.bf16.mxu0 %v2095_v32  ;;  %436 = vmatprep.subr.bf16.mxu1 %v2097_v33  ;;  %v2432_v13 = vld [vmem:[%s3229_s3 + $0xd0] sm:$0xff]   ;;  %v2435_v16 = vld [vmem:[%s3229_s3 + $0x58] sm:$0xff]   ;;  %v2439_v20 = vld [vmem:[%s3229_s3 + $0x60] sm:$0xff]  }
  0x10   :  { %423 = vmatprep.mubr.bf16.mxu0 %v2575_v8  ;;  %466 = vmatprep.mubr.bf16.mxu1 %v2575_v8  ;;  %v2433_v14 = vld [vmem:[%s3229_s3 + $0x10] sm:$0xff]   ;;  %v2436_v17 = vld [vmem:[%s3229_s3 + $0xd8] sm:$0xff]   ;;  %v2440_v21 = vld [vmem:[%s3229_s3 + $0xe0] sm:$0xff]  }
  0x11   :  { %v2434_v15 = vld [vmem:[%s3229_s3 + $0x90] sm:$0xff]   ;;  %v2437_v18 = vld [vmem:[%s3229_s3 + $0x18] sm:$0xff]   ;;  %v2441_v22 = vld [vmem:[%s3229_s3 + $0x20] sm:$0xff]  }
  0x12   :  { %394 = vmatpush1.bf16.msra.mxu0 %v2094_v38  ;;  %437 = vmatpush1.bf16.msra.mxu1 %v2096_v40  ;;  %v2438_v19 = vld [vmem:[%s3229_s3 + $0x98] sm:$0xff]   ;;  %v2442_v23 = vld [vmem:[%s3229_s3 + $0xa0] sm:$0xff]   ;;  %v2443_v24 = vld [vmem:[%s3229_s3 + $0x68] sm:$0xff]  }
  0x13   :  { %477 = vmatprep.subr.bf16.mxu0 %v2083_v41  ;;  %520 = vmatprep.subr.bf16.mxu1 %v2085_v43  ;;  %v2444_v25 = vld [vmem:[%s3229_s3 + $0xe8] sm:$0xff]   ;;  %v2447_v28 = vld [vmem:[%s3229_s3 + $0x70] sm:$0xff]   ;;  %v2451_v32 = vld [vmem:[%s3229_s3 + $0x78] sm:$0xff]  }
  0x14   :  { %v2445_v26 = vld [vmem:[%s3229_s3 + $0x28] sm:$0xff]   ;;  %v2448_v29 = vld [vmem:[%s3229_s3 + $0xf0] sm:$0xff]   ;;  %v2452_v33 = vld [vmem:[%s3229_s3 + $0xf8] sm:$0xff]  }
  0x15   :  { %2108 = vmatmul.mubr.msk.bf16.vlgmr.msra.gmra.mrb[4].mxu0 %vm301_vm0, %v2659_v27  ;;  %2109 = vmatmul.mubr.msk.bf16.vlgmr.msra.gmra.mrb[4].mxu1 %vm301_vm0, %v2659_v27  ;;  %v2449_v30 = vld [vmem:[%s3229_s3 + $0x30] sm:$0xff]   ;;  %v2453_v34 = vld [vmem:[%s3229_s3 + $0x38] sm:$0xff]   ;;  %v2455_v36 = vld [vmem:[%s3229_s3 + $0x140] sm:$0xff]  }
  0x16   :  { %478 = vmatpush1.bf16.msra.mxu0 %v2082_v46  ;;  %521 = vmatpush1.bf16.msra.mxu1 %v2084_v48  ;;  %v2450_v31 = vld [vmem:[%s3229_s3 + $0xb0] sm:$0xff]   ;;  %v2454_v35 = vld [vmem:[%s3229_s3 + $0xb8] sm:$0xff]   ;;  %v2456_v37 = vld [vmem:[%s3229_s3 + $0x1c0] sm:$0xff]  }
  0x17   :  { %479 = vmatprep.subr.bf16.mxu0 %v2099_v49  ;;  %522 = vmatprep.subr.bf16.mxu1 %v2101_v51 }
  0x18   :  { %509 = vmatprep.mubr.bf16.mxu0 %v2575_v8  ;;  %552 = vmatprep.mubr.bf16.mxu1 %v2575_v8 }
  0x1a   :  { %480 = vmatpush1.bf16.msra.mxu0 %v2098_v54  ;;  %523 = vmatpush1.bf16.msra.mxu1 %v2100_v56 }
  0x1b   :  { %563 = vmatprep.subr.bf16.mxu0 %v2087_v57  ;;  %606 = vmatprep.subr.bf16.mxu1 %v2089_v59 }
  0x1d   :  { %2110 = vmatmul.mubr.msk.bf16.vlgmr.msra.gmra.mrb[8].mxu0 %vm301_vm0, %v2659_v27  ;;  %2111 = vmatmul.mubr.msk.bf16.vlgmr.msra.gmra.mrb[8].mxu1 %vm301_vm0, %v2659_v27 }
  0x1e   :  { %564 = vmatpush1.bf16.msra.mxu0 %v2086_v62  ;;  %607 = vmatpush1.bf16.msra.mxu1 %v2088_v63 }
  0x1f   :  { %565 = vmatprep.subr.bf16.mxu0 %v2103_v0  ;;  %608 = vmatprep.subr.bf16.mxu1 %v2105_v1 }
  0x20   :  { %595 = vmatprep.mubr.bf16.mxu0 %v2575_v8  ;;  %638 = vmatprep.mubr.bf16.mxu1 %v2575_v8  ;;  %v2429_v8 = vld [vmem:[%s3229_s3 + $0x8] sm:$0xff]  }
  0x22   :  { %566 = vmatpush1.bf16.msra.mxu0 %v2102_v2  ;;  %609 = vmatpush1.bf16.msra.mxu1 %v2104_v4 }
  0x23   :  { %2243 = vmatprep.subr.bf16.mxu0 %v2423_v3  ;;  %2265 = vmatprep.subr.bf16.mxu1 %v2424_v5 }
  0x25   :  { %2112 = vmatmul.mubr.msk.bf16.vlgmr.msra.gmra.mrb[12].mxu0 %vm301_vm0, %v2659_v27  ;;  %2113 = vmatmul.mubr.msk.bf16.vlgmr.msra.gmra.mrb[12].mxu1 %vm301_vm0, %v2659_v27  ;;  %v2446_v27 = vld [vmem:[%s3229_s3 + $0xa8] sm:$0xff]  }
  0x26   :  { %2244 = vmatpush3.bf16.msra.mxu0 %v2425_v6  ;;  %2266 = vmatpush3.bf16.msra.mxu1 %v2426_v7 }
  0x27   :  { %2245 = vmatprep.subr.bf16.mxu0 %v2427_v9  ;;  %2267 = vmatprep.subr.bf16.mxu1 %v2428_v10 }
  0x2a   :  { %2246 = vmatpush3.bf16.msra.mxu0 %v2429_v8  ;;  %2268 = vmatpush3.bf16.msra.mxu1 %v2430_v11 }
  0x2b   :  { %2247 = vmatprep.subr.bf16.mxu0 %v2431_v12  ;;  %2269 = vmatprep.subr.bf16.mxu1 %v2432_v13 }
  0x2e   :  { %2248 = vmatpush3.bf16.msra.mxu0 %v2433_v14  ;;  %2270 = vmatpush3.bf16.msra.mxu1 %v2434_v15 }
  0x2f   :  { %2249 = vmatprep.subr.bf16.mxu0 %v2435_v16  ;;  %2271 = vmatprep.subr.bf16.mxu1 %v2436_v17 }
  0x32   :  { %2250 = vmatpush3.bf16.msra.mxu0 %v2437_v18  ;;  %2272 = vmatpush3.bf16.msra.mxu1 %v2438_v19 }
  0x33   :  { %2251 = vmatprep.subr.bf16.mxu0 %v2439_v20  ;;  %2273 = vmatprep.subr.bf16.mxu1 %v2440_v21 }
  0x36   :  { %2252 = vmatpush3.bf16.msra.mxu0 %v2441_v22  ;;  %2274 = vmatpush3.bf16.msra.mxu1 %v2442_v23 }
  0x37   :  { %2253 = vmatprep.subr.bf16.mxu0 %v2443_v24  ;;  %2275 = vmatprep.subr.bf16.mxu1 %v2444_v25 }
  0x3a   :  { %2254 = vmatpush3.bf16.msra.mxu0 %v2445_v26  ;;  %2276 = vmatpush3.bf16.msra.mxu1 %v2446_v27 }
  0x3b   :  { %2255 = vmatprep.subr.bf16.mxu0 %v2447_v28  ;;  %2277 = vmatprep.subr.bf16.mxu1 %v2448_v29 }
  0x3e   :  { %2256 = vmatpush3.bf16.msra.mxu0 %v2449_v30  ;;  %2278 = vmatpush3.bf16.msra.mxu1 %v2450_v31 }
  0x3f   :  { %2257 = vmatprep.subr.bf16.mxu0 %v2451_v32  ;;  %2279 = vmatprep.subr.bf16.mxu1 %v2452_v33 }
  0x42   :  { %2258 = vmatpush3.bf16.msra.mxu0 %v2453_v34  ;;  %2280 = vmatpush3.bf16.msra.mxu1 %v2454_v35 }
  0x43   :  { %2287 = vmatprep.subr.bf16.mxu0 %v2455_v36  ;;  %2309 = vmatprep.subr.bf16.mxu1 %v2456_v37 }
  0x44   :  { %10 = vsyncpa [#allocation3], 0  ;;  %v61_v38 = vlaneseq  ;;  %v57_v41 = vld [vmem:[%s3228_s2] sm:$0xff]  ;;  %v2459_v24 = vld [vmem:[%s3229_s3 + $0x148] sm:$0xff]  }
  0x45   :  { %v2457_v20 = vld [vmem:[%s3229_s3 + $0x100] sm:$0xff]   ;;  %v2460_v28 = vld [vmem:[%s3229_s3 + $0x1c8] sm:$0xff]  }
  0x46   :  { %v2839_v39 = vshrl.u32 %v61_v38, 7  ;;  %v2458_v23 = vld [vmem:[%s3229_s3 + $0x180] sm:$0xff]   ;;  %v2883_v33 = vld [vmem:[%s3228_s2 + $0x8] sm:$0xff] }
  0x48   :  { %v63_v40 = vsub.s32 0, %v2839_v39  ;;  %v71_v42 = vsub.s32 2, %v2839_v39  ;;  %v67_v43 = vsub.s32 1, %v2839_v39  ;;  %v75_v44 = vsub.s32 3, %v2839_v39 }
  0x49   :  { %v79_v49 = vsub.s32 4, %v2839_v39  ;;  %v83_v51 = vsub.s32 5, %v2839_v39  ;;  %v87_v59 = vsub.s32 6, %v2839_v39  ;;  %v91_v1 = vsub.s32 7, %v2839_v39  ;;  %v2475_v39 = vld [vmem:[%s3229_s3 + $0x168] sm:$0xff]  }
  0x4a   :  { %v64_v45 = vrot.slane %v57_v41, %v63_v40  ;;  %v72_v46 = vrot.slane %v57_v41, %v71_v42  ;;  %v68_v47 = vrot.slane %v57_v41, %v67_v43  ;;  %v76_v48 = vrot.slane %v57_v41, %v75_v44 }
  0x4b   :  { %v80_v0 = vrot.slane %v57_v41, %v79_v49  ;;  %v84_v6 = vrot.slane %v57_v41, %v83_v51  ;;  %v88_v14 = vrot.slane %v57_v41, %v87_v59  ;;  %v92_v17 = vrot.slane %v57_v41, %v91_v1  ;;  %v2461_v41 = vld [vmem:[%s3229_s3 + $0x108] sm:$0xff]  }
  0xe0   :  { %v339_v50 = vpop.f32.mrb[0].mxu0  ;;  %v382_v53 = vpop.f32.mrb[0].mxu1 }
  0xe1   :  { %v340_v52 = vadd.f32 %v339_v50, %v64_v45  ;;  %v341_v54 = vpop.f32.mrb[1].mxu0  ;;  %v383_v55 = vadd.f32 %v382_v53, %v72_v46  ;;  %v384_v57 = vpop.f32.mrb[1].mxu1  ;;  %v2463_v53 = vld [vmem:[%s3229_s3 + $0x150] sm:$0xff]  }
  0xe2   :  { %v342_v56 = vadd.f32 %v341_v54, %v68_v47  ;;  %v343_v58 = vpop.f32.mrb[2].mxu0  ;;  %v385_v60 = vadd.f32 %v384_v57, %v76_v48  ;;  %v386_v62 = vpop.f32.mrb[2].mxu1  ;;  %v96_v57 = vrot.slane %v2883_v33, %v63_v40  ;;  %v108_v40 = vrot.slane %v2883_v33, %v75_v44 }
  0xe3   :  { %v344_v61 = vadd.f32 %v343_v58, %v64_v45  ;;  %v345_v63 = vpop.f32.mrb[3].mxu0  ;;  %v651_v2 = vmax.f32 %v383_v55, 0.0  ;;  %v387_v3 = vadd.f32 %v386_v62, %v72_v46  ;;  %v388_v5 = vpop.f32.mrb[3].mxu1  ;;  %v649_v7 = vmax.f32 %v340_v52, 0.0  ;;  %v2462_v52 = vld [vmem:[%s3229_s3 + $0x188] sm:$0xff]   ;;  %v2464_v58 = vld [vmem:[%s3229_s3 + $0x1d0] sm:$0xff]  }
  0xe4   :  { %v346_v4 = vadd.f32 %v345_v63, %v68_v47  ;;  %v652_v9 = vmax.f32 %v385_v60, 0.0  ;;  %v389_v8 = vadd.f32 %v388_v5, %v76_v48  ;;  %v650_v11 = vmax.f32 %v342_v56, 0.0 }
  0xe5   :  { %v665_v10 = vmax.f32 %v344_v61, 0.0  ;;  %v667_v12 = vmax.f32 %v387_v3, 0.0  ;;  %v100_v62 = vrot.slane %v2883_v33, %v67_v43  ;;  %v104_v63 = vrot.slane %v2883_v33, %v71_v42  ;;  %v2465_v3 = vld [vmem:[%s3229_s3 + $0x110] sm:$0xff]  }
  0xe6   :  { %v666_v13 = vmax.f32 %v346_v4, 0.0  ;;  %v668_v16 = vmax.f32 %v389_v8, 0.0  ;;  %v2466_v42 = vld [vmem:[%s3229_s3 + $0x190] sm:$0xff]   ;;  %v2468_v8 = vld [vmem:[%s3229_s3 + $0x1d8] sm:$0xff]  }
  0xe7   :  { %v681_v15 = vpack.c.bf16 %v665_v10, %v649_v7  ;;  %v683_v18 = vpack.c.bf16 %v667_v12, %v651_v2 }
  0xe8   :  { %v682_v19 = vpack.c.bf16 %v666_v13, %v650_v11  ;;  %v425_v21 = vpop.f32.mrb[4].mxu0  ;;  %v684_v22 = vpack.c.bf16 %v668_v16, %v652_v9  ;;  %v468_v27 = vpop.f32.mrb[4].mxu1 }
  0xe9   :  { %v426_v25 = vadd.f32 %v425_v21, %v80_v0  ;;  %v427_v26 = vpop.f32.mrb[5].mxu0  ;;  %v469_v31 = vadd.f32 %v468_v27, %v88_v14  ;;  %v470_v32 = vpop.f32.mrb[5].mxu1  ;;  %v2471_v27 = vld [vmem:[%s3229_s3 + $0x160] sm:$0xff]  }
  0xea   :  { %1760 = vmatprep.mubr.bf16.mxu0 %v682_v19  ;;  %v428_v29 = vadd.f32 %v427_v26, %v84_v6  ;;  %v429_v30 = vpop.f32.mrb[6].mxu0  ;;  %1801 = vmatprep.mubr.bf16.mxu1 %v684_v22  ;;  %v471_v37 = vadd.f32 %v470_v32, %v92_v17  ;;  %v472_v38 = vpop.f32.mrb[6].mxu1  ;;  %v2470_v26 = vld [vmem:[%s3229_s3 + $0x198] sm:$0xff]   ;;  %v2472_v32 = vld [vmem:[%s3229_s3 + $0x1e0] sm:$0xff]  }
  0xeb   :  { %1761 = vmatmul.mubr.bf16.vlgmr.msra.gmra.mrb[16].mxu0 %v681_v15  ;;  %v653_v34 = vmax.f32 %v426_v25, 0.0  ;;  %v430_v35 = vadd.f32 %v429_v30, %v80_v0  ;;  %v431_v36 = vpop.f32.mrb[7].mxu0  ;;  %1802 = vmatmul.mubr.bf16.vlgmr.msra.gmra.mrb[16].mxu1 %v683_v18  ;;  %v655_v46 = vmax.f32 %v469_v31, 0.0  ;;  %v473_v48 = vadd.f32 %v472_v38, %v88_v14  ;;  %v474_v50 = vpop.f32.mrb[7].mxu1 }
  0xec   :  { %2288 = vmatpush3.bf16.msra.mxu0 %v2457_v20  ;;  %v654_v45 = vmax.f32 %v428_v29, 0.0  ;;  %v432_v47 = vadd.f32 %v431_v36, %v84_v6  ;;  %2310 = vmatpush3.bf16.msra.mxu1 %v2458_v23  ;;  %v656_v55 = vmax.f32 %v471_v37, 0.0  ;;  %v475_v56 = vadd.f32 %v474_v50, %v92_v17  ;;  %v2467_v6 = vld [vmem:[%s3229_s3 + $0x158] sm:$0xff]  }
  0xed   :  { %2289 = vmatprep.subr.bf16.mxu0 %v2459_v24  ;;  %v669_v54 = vmax.f32 %v430_v35, 0.0  ;;  %2311 = vmatprep.subr.bf16.mxu1 %v2460_v28  ;;  %v671_v61 = vmax.f32 %v473_v48, 0.0  ;;  %v2469_v20 = vld [vmem:[%s3229_s3 + $0x118] sm:$0xff]   ;;  %v112_v31 = vrot.slane %v2883_v33, %v79_v49  ;;  %v116_v36 = vrot.slane %v2883_v33, %v83_v51 }
  0xee   :  { %v670_v60 = vmax.f32 %v432_v47, 0.0  ;;  %v672_v2 = vmax.f32 %v475_v56, 0.0  ;;  %v120_v37 = vrot.slane %v2883_v33, %v87_v59  ;;  %v124_v49 = vrot.slane %v2883_v33, %v91_v1  ;;  %v2474_v59 = vld [vmem:[%s3229_s3 + $0x1a0] sm:$0xff]  }
  0xef   :  { %v2906_v0 = vpack.c.bf16 %v669_v54, %v653_v34  ;;  %v2914_v5 = vpack.c.bf16 %v671_v61, %v655_v46 }
  0xf0   :  { %2290 = vmatpush3.bf16.msra.mxu0 %v2461_v41  ;;  %v686_v4 = vpack.c.bf16 %v670_v60, %v654_v45  ;;  %v511_v43 = vpop.f32.mrb[8].mxu0  ;;  %2312 = vmatpush3.bf16.msra.mxu1 %v2462_v52  ;;  %v688_v44 = vpack.c.bf16 %v672_v2, %v656_v55  ;;  %v554_v10 = vpop.f32.mrb[8].mxu1  ;;  %v2473_v45 = vld [vmem:[%s3229_s3 + $0x120] sm:$0xff]   ;;  %v2476_v52 = vld [vmem:[%s3229_s3 + $0x1e8] sm:$0xff]  }
  0xf1   :  { %2291 = vmatprep.subr.bf16.mxu0 %v2463_v53  ;;  %v512_v7 = vadd.f32 %v511_v43, %v96_v57  ;;  %v513_v9 = vpop.f32.mrb[9].mxu0  ;;  %2313 = vmatprep.subr.bf16.mxu1 %v2464_v58  ;;  %v555_v13 = vadd.f32 %v554_v10, %v104_v63  ;;  %v556_v14 = vpop.f32.mrb[9].mxu1  ;;  %v2480_v10 = vld [vmem:[%s3229_s3 + $0x1f0] sm:$0xff]  }
  0xf2   :  { %1842 = vmatprep.mubr.bf16.mxu0 %v686_v4  ;;  %v514_v11 = vadd.f32 %v513_v9, %v100_v62  ;;  %v515_v12 = vpop.f32.mrb[10].mxu0  ;;  %1883 = vmatprep.mubr.bf16.mxu1 %v688_v44  ;;  %v557_v18 = vadd.f32 %v556_v14, %v108_v40  ;;  %v558_v19 = vpop.f32.mrb[10].mxu1  ;;  %v2481_v14 = vld [vmem:[%s3229_s3 + $0x130] sm:$0xff]  }
  0xf3   :  { %v657_v15 = vmax.f32 %v512_v7, 0.0  ;;  %v516_v16 = vadd.f32 %v515_v12, %v96_v57  ;;  %v517_v17 = vpop.f32.mrb[11].mxu0  ;;  %v659_v22 = vmax.f32 %v555_v13, 0.0  ;;  %v559_v24 = vadd.f32 %v558_v19, %v104_v63  ;;  %v560_v25 = vpop.f32.mrb[11].mxu1  ;;  %v2477_v63 = vld [vmem:[%s3229_s3 + $0x128] sm:$0xff]  }
  0xf4   :  { %2292 = vmatpush3.bf16.msra.mxu0 %v2465_v3  ;;  %v658_v21 = vmax.f32 %v514_v11, 0.0  ;;  %v518_v23 = vadd.f32 %v517_v17, %v100_v62  ;;  %2314 = vmatpush3.bf16.msra.mxu1 %v2466_v42  ;;  %v660_v29 = vmax.f32 %v557_v18, 0.0  ;;  %v561_v30 = vadd.f32 %v560_v25, %v108_v40  ;;  %v2478_v42 = vld [vmem:[%s3229_s3 + $0x1a8] sm:$0xff]   ;;  %v2482_v17 = vld [vmem:[%s3229_s3 + $0x1b0] sm:$0xff]   ;;  %v2483_v18 = vld [vmem:[%s3229_s3 + $0x178] sm:$0xff]  }
  0xf5   :  { %2293 = vmatprep.subr.bf16.mxu0 %v2467_v6  ;;  %v673_v28 = vmax.f32 %v516_v16, 0.0  ;;  %2315 = vmatprep.subr.bf16.mxu1 %v2468_v8  ;;  %v675_v35 = vmax.f32 %v559_v24, 0.0  ;;  %v2479_v6 = vld [vmem:[%s3229_s3 + $0x170] sm:$0xff]   ;;  %v2488_v24 = vld [vmem:[%s3229_s3 + $0x2c0] sm:$0xff]  }
  0xf6   :  { %v674_v34 = vmax.f32 %v518_v23, 0.0  ;;  %v676_v41 = vmax.f32 %v561_v30, 0.0  ;;  %v2487_v23 = vld [vmem:[%s3229_s3 + $0x240] sm:$0xff]   ;;  %v2494_v30 = vld [vmem:[%s3229_s3 + $0x288] sm:$0xff]  }
  0xf7   :  { %v2946_v38 = vpack.c.bf16 %v673_v28, %v657_v15  ;;  %v2956_v47 = vpack.c.bf16 %v675_v35, %v659_v22  ;;  %v2486_v22 = vld [vmem:[%s3229_s3 + $0x1b8] sm:$0xff]   ;;  %v2489_v25 = vld [vmem:[%s3229_s3 + $0x200] sm:$0xff]   ;;  %v2492_v28 = vld [vmem:[%s3229_s3 + $0x2c8] sm:$0xff]  }
  0xf8   :  { %2294 = vmatpush3.bf16.msra.mxu0 %v2469_v20  ;;  %v2954_v46 = vpack.c.bf16 %v674_v34, %v658_v21  ;;  %v597_v51 = vpop.f32.mrb[12].mxu0  ;;  %2316 = vmatpush3.bf16.msra.mxu1 %v2470_v26  ;;  %v2964_v1 = vpack.c.bf16 %v676_v41, %v660_v29  ;;  %v640_v50 = vpop.f32.mrb[12].mxu1  ;;  %v2484_v20 = vld [vmem:[%s3229_s3 + $0x1f8] sm:$0xff]   ;;  %v2490_v26 = vld [vmem:[%s3229_s3 + $0x280] sm:$0xff]   ;;  %v2493_v29 = vld [vmem:[%s3229_s3 + $0x208] sm:$0xff]  }
  0xf9   :  { %2295 = vmatprep.subr.bf16.mxu0 %v2471_v27  ;;  %v598_v33 = vadd.f32 %v597_v51, %v112_v31  ;;  %v599_v48 = vpop.f32.mrb[13].mxu0  ;;  %2317 = vmatprep.subr.bf16.mxu1 %v2472_v32  ;;  %v641_v55 = vadd.f32 %v640_v50, %v120_v37  ;;  %v642_v56 = vpop.f32.mrb[13].mxu1  ;;  %v2485_v21 = vld [vmem:[%s3229_s3 + $0x138] sm:$0xff]   ;;  %v2491_v27 = vld [vmem:[%s3229_s3 + $0x248] sm:$0xff]   ;;  %v2498_v32 = vld [vmem:[%s3229_s3 + $0x290] sm:$0xff]  }
  0xfa   :  { %v600_v53 = vadd.f32 %v599_v48, %v116_v36  ;;  %v601_v54 = vpop.f32.mrb[14].mxu0  ;;  %v643_v61 = vadd.f32 %v642_v56, %v124_v49  ;;  %v644_v62 = vpop.f32.mrb[14].mxu1  ;;  %v2499_v34 = vld [vmem:[%s3229_s3 + $0x258] sm:$0xff]   ;;  %v2503_v41 = vld [vmem:[%s3229_s3 + $0x260] sm:$0xff]   ;;  %v2507_v51 = vld [vmem:[%s3229_s3 + $0x268] sm:$0xff]  }
  0xfb   :  { %v661_v57 = vmax.f32 %v598_v33, 0.0  ;;  %v602_v58 = vadd.f32 %v601_v54, %v112_v31  ;;  %v603_v60 = vpop.f32.mrb[15].mxu0  ;;  %v663_v40 = vmax.f32 %v641_v55, 0.0  ;;  %v645_v4 = vadd.f32 %v644_v62, %v120_v37  ;;  %v646_v43 = vpop.f32.mrb[15].mxu1  ;;  %v2495_v31 = vld [vmem:[%s3229_s3 + $0x250] sm:$0xff]   ;;  %v2500_v35 = vld [vmem:[%s3229_s3 + $0x2d8] sm:$0xff]  }
  0xfc   :  { %2296 = vmatpush3.bf16.msra.mxu0 %v2473_v45  ;;  %v662_v2 = vmax.f32 %v600_v53, 0.0  ;;  %v604_v3 = vadd.f32 %v603_v60, %v116_v36  ;;  %2318 = vmatpush3.bf16.msra.mxu1 %v2474_v59  ;;  %v664_v7 = vmax.f32 %v643_v61, 0.0  ;;  %v647_v9 = vadd.f32 %v646_v43, %v124_v49  ;;  %v2501_v36 = vld [vmem:[%s3229_s3 + $0x218] sm:$0xff]   ;;  %v2504_v49 = vld [vmem:[%s3229_s3 + $0x2e0] sm:$0xff]   ;;  %v2508_v59 = vld [vmem:[%s3229_s3 + $0x2e8] sm:$0xff]  }
  0xfd   :  { %2297 = vmatprep.subr.bf16.mxu0 %v2475_v39  ;;  %v677_v44 = vmax.f32 %v602_v58, 0.0  ;;  %2319 = vmatprep.subr.bf16.mxu1 %v2476_v52  ;;  %v679_v11 = vmax.f32 %v645_v4, 0.0  ;;  %v2502_v37 = vld [vmem:[%s3229_s3 + $0x298] sm:$0xff]   ;;  %v2505_v45 = vld [vmem:[%s3229_s3 + $0x220] sm:$0xff]   ;;  %v2509_v39 = vld [vmem:[%s3229_s3 + $0x228] sm:$0xff]  }
  0xfe   :  { %v678_v8 = vmax.f32 %v604_v3, 0.0  ;;  %v680_v13 = vmax.f32 %v647_v9, 0.0  ;;  %v2511_v33 = vld [vmem:[%s3229_s3 + $0x270] sm:$0xff]   ;;  %v2515_v53 = vld [vmem:[%s3229_s3 + $0x278] sm:$0xff]   ;;  %v2520_v58 = vld [vmem:[%s3229_s3 + $0x3c0] sm:$0xff]  }
  0xff   :  { %v2981_v12 = vpack.c.bf16 %v677_v44, %v661_v57  ;;  %v2988_v16 = vpack.c.bf16 %v679_v11, %v663_v40  ;;  %v2512_v48 = vld [vmem:[%s3229_s3 + $0x2f0] sm:$0xff]   ;;  %v2516_v54 = vld [vmem:[%s3229_s3 + $0x2f8] sm:$0xff]   ;;  %v2519_v57 = vld [vmem:[%s3229_s3 + $0x340] sm:$0xff]  }
 0x100   :  { %2298 = vmatpush3.bf16.msra.mxu0 %v2477_v63  ;;  %v2986_v15 = vpack.c.bf16 %v678_v8, %v662_v2  ;;  %2320 = vmatpush3.bf16.msra.mxu1 %v2478_v42  ;;  %v2996_v19 = vpack.c.bf16 %v680_v13, %v664_v7  ;;  %v2513_v50 = vld [vmem:[%s3229_s3 + $0x230] sm:$0xff]   ;;  %v2517_v55 = vld [vmem:[%s3229_s3 + $0x238] sm:$0xff]   ;;  %v2521_v60 = vld [vmem:[%s3229_s3 + $0x300] sm:$0xff]  }
 0x101   :  { %2299 = vmatprep.subr.bf16.mxu0 %v2479_v6  ;;  %2321 = vmatprep.subr.bf16.mxu1 %v2480_v10  ;;  %v2514_v52 = vld [vmem:[%s3229_s3 + $0x2b0] sm:$0xff]   ;;  %v2518_v56 = vld [vmem:[%s3229_s3 + $0x2b8] sm:$0xff]   ;;  %v2522_v61 = vld [vmem:[%s3229_s3 + $0x380] sm:$0xff]  }
 0x102   :  { %v2523_v62 = vld [vmem:[%s3229_s3 + $0x348] sm:$0xff]   ;;  %v2527_v3 = vld [vmem:[%s3229_s3 + $0x350] sm:$0xff]   ;;  %v2531_v43 = vld [vmem:[%s3229_s3 + $0x358] sm:$0xff]  }
 0x103   :  { %v2524_v63 = vld [vmem:[%s3229_s3 + $0x3c8] sm:$0xff]   ;;  %v2530_v4 = vld [vmem:[%s3229_s3 + $0x390] sm:$0xff]   ;;  %v2532_v42 = vld [vmem:[%s3229_s3 + $0x3d8] sm:$0xff]  }
 0x104   :  { %2300 = vmatpush3.bf16.msra.mxu0 %v2481_v14  ;;  %2322 = vmatpush3.bf16.msra.mxu1 %v2482_v17  ;;  %v2525_v2 = vld [vmem:[%s3229_s3 + $0x308] sm:$0xff]   ;;  %v2533_v6 = vld [vmem:[%s3229_s3 + $0x318] sm:$0xff]   ;;  %v2535_v7 = vld [vmem:[%s3229_s3 + $0x360] sm:$0xff]  }
 0x105   :  { %2301 = vmatprep.subr.bf16.mxu0 %v2483_v18  ;;  %2323 = vmatprep.subr.bf16.mxu1 %v2484_v20  ;;  %v2526_v40 = vld [vmem:[%s3229_s3 + $0x388] sm:$0xff]   ;;  %v2534_v44 = vld [vmem:[%s3229_s3 + $0x398] sm:$0xff]   ;;  %v2536_v9 = vld [vmem:[%s3229_s3 + $0x3e0] sm:$0xff]  }
 0x106   :  { %v2537_v10 = vld [vmem:[%s3229_s3 + $0x320] sm:$0xff]   ;;  %v2539_v11 = vld [vmem:[%s3229_s3 + $0x368] sm:$0xff]   ;;  %v2543_v17 = vld [vmem:[%s3229_s3 + $0x370] sm:$0xff]  }
 0x107   :  { %v2538_v8 = vld [vmem:[%s3229_s3 + $0x3a0] sm:$0xff]   ;;  %v2540_v13 = vld [vmem:[%s3229_s3 + $0x3e8] sm:$0xff]   ;;  %v2544_v18 = vld [vmem:[%s3229_s3 + $0x3f0] sm:$0xff]  }
 0x108   :  { %2302 = vmatpush3.bf16.msra.mxu0 %v2485_v21  ;;  %2324 = vmatpush3.bf16.msra.mxu1 %v2486_v22  ;;  %v2541_v14 = vld [vmem:[%s3229_s3 + $0x328] sm:$0xff]   ;;  %v2546_v20 = vld [vmem:[%s3229_s3 + $0x3b0] sm:$0xff]   ;;  %v2547_v21 = vld [vmem:[%s3229_s3 + $0x378] sm:$0xff]  }
 0x109   :  { %2331 = vmatprep.subr.bf16.mxu0 %v2487_v23  ;;  %2353 = vmatprep.subr.bf16.mxu1 %v2488_v24  ;;  %v2548_v22 = vld [vmem:[%s3229_s3 + $0x3f8] sm:$0xff]  }
 0x10a   :  { %v2549_v23 = vld [vmem:[%s3229_s3 + $0x338] sm:$0xff]  }
 0x10b   :  { %1843 = vmatmul.mubr.bf16.vlgmr.msra.gmra.mrb[20].mxu0 %v2906_v0  ;;  %1884 = vmatmul.mubr.bf16.vlgmr.msra.gmra.mrb[20].mxu1 %v2914_v5  ;;  %v2496_v0 = vld [vmem:[%s3229_s3 + $0x2d0] sm:$0xff]   ;;  %v2550_v24 = vld [vmem:[%s3229_s3 + $0x3b8] sm:$0xff]  }
 0x10c   :  { %2332 = vmatpush3.bf16.msra.mxu0 %v2489_v25  ;;  %2354 = vmatpush3.bf16.msra.mxu1 %v2490_v26  ;;  %v2497_v5 = vld [vmem:[%s3229_s3 + $0x210] sm:$0xff]  }
 0x10d   :  { %2333 = vmatprep.subr.bf16.mxu0 %v2491_v27  ;;  %2355 = vmatprep.subr.bf16.mxu1 %v2492_v28  ;;  %v2114_v27 = vld [vmem:[%s3230_s4] ss:$0 sm:$0xff] }
 0x10e   :  { %1924 = vmatprep.mubr.bf16.mxu0 %v2954_v46  ;;  %1965 = vmatprep.mubr.bf16.mxu1 %v2964_v1  ;;  %v2506_v46 = vld [vmem:[%s3229_s3 + $0x2a0] sm:$0xff]   ;;  %v2510_v1 = vld [vmem:[%s3229_s3 + $0x2a8] sm:$0xff]  }
 0x110   :  { %2334 = vmatpush3.bf16.msra.mxu0 %v2493_v29  ;;  %2356 = vmatpush3.bf16.msra.mxu1 %v2494_v30 }
 0x111   :  { %2335 = vmatprep.subr.bf16.mxu0 %v2495_v31  ;;  %2357 = vmatprep.subr.bf16.mxu1 %v2496_v0 }
 0x114   :  { %2336 = vmatpush3.bf16.msra.mxu0 %v2497_v5  ;;  %2358 = vmatpush3.bf16.msra.mxu1 %v2498_v32 }
 0x115   :  { %2337 = vmatprep.subr.bf16.mxu0 %v2499_v34  ;;  %2359 = vmatprep.subr.bf16.mxu1 %v2500_v35 }
 0x118   :  { %2338 = vmatpush3.bf16.msra.mxu0 %v2501_v36  ;;  %2360 = vmatpush3.bf16.msra.mxu1 %v2502_v37 }
 0x119   :  { %2339 = vmatprep.subr.bf16.mxu0 %v2503_v41  ;;  %2361 = vmatprep.subr.bf16.mxu1 %v2504_v49 }
 0x11c   :  { %2340 = vmatpush3.bf16.msra.mxu0 %v2505_v45  ;;  %2362 = vmatpush3.bf16.msra.mxu1 %v2506_v46 }
 0x11d   :  { %2341 = vmatprep.subr.bf16.mxu0 %v2507_v51  ;;  %2363 = vmatprep.subr.bf16.mxu1 %v2508_v59 }
 0x120   :  { %2342 = vmatpush3.bf16.msra.mxu0 %v2509_v39  ;;  %2364 = vmatpush3.bf16.msra.mxu1 %v2510_v1 }
 0x121   :  { %2343 = vmatprep.subr.bf16.mxu0 %v2511_v33  ;;  %2365 = vmatprep.subr.bf16.mxu1 %v2512_v48 }
 0x124   :  { %2344 = vmatpush3.bf16.msra.mxu0 %v2513_v50  ;;  %2366 = vmatpush3.bf16.msra.mxu1 %v2514_v52 }
 0x125   :  { %2345 = vmatprep.subr.bf16.mxu0 %v2515_v53  ;;  %2367 = vmatprep.subr.bf16.mxu1 %v2516_v54 }
 0x128   :  { %2346 = vmatpush3.bf16.msra.mxu0 %v2517_v55  ;;  %2368 = vmatpush3.bf16.msra.mxu1 %v2518_v56 }
 0x129   :  { %2375 = vmatprep.subr.bf16.mxu0 %v2519_v57  ;;  %2397 = vmatprep.subr.bf16.mxu1 %v2520_v58 }
 0x12b   :  { %1925 = vmatmul.mubr.bf16.vlgmr.msra.gmra.mrb[24].mxu0 %v2946_v38  ;;  %1966 = vmatmul.mubr.bf16.vlgmr.msra.gmra.mrb[24].mxu1 %v2956_v47  ;;  %v2528_v38 = vld [vmem:[%s3229_s3 + $0x3d0] sm:$0xff]  }
 0x12c   :  { %2376 = vmatpush3.bf16.msra.mxu0 %v2521_v60  ;;  %2398 = vmatpush3.bf16.msra.mxu1 %v2522_v61  ;;  %v2529_v47 = vld [vmem:[%s3229_s3 + $0x310] sm:$0xff]  }
 0x12d   :  { %2377 = vmatprep.subr.bf16.mxu0 %v2523_v62  ;;  %2399 = vmatprep.subr.bf16.mxu1 %v2524_v63 }
 0x12e   :  { %2006 = vmatprep.mubr.bf16.mxu0 %v2986_v15  ;;  %2047 = vmatprep.mubr.bf16.mxu1 %v2996_v19  ;;  %v2542_v15 = vld [vmem:[%s3229_s3 + $0x3a8] sm:$0xff]   ;;  %v2545_v19 = vld [vmem:[%s3229_s3 + $0x330] sm:$0xff]   ;;  %s2576_s3 = smov [#allocation2]  }
 0x12f   :  { %s2063_s4 = sshll.u32 %s2576_s3, 4  ;;  %s2064_s4 = int_to_ptr.vmem [resolvable:$true] %s2063_s4 }
 0x130   :  { %2378 = vmatpush3.bf16.msra.mxu0 %v2525_v2  ;;  %2400 = vmatpush3.bf16.msra.mxu1 %v2526_v40  ;;  %s2551_s20 = scalar_lea.vmem %s2064_s4, 256  ;;  %p2556_p1 = scmp.lt.s32.totalorder %s2064_s4, %s2064_s4 }
 0x131   :  { %2379 = vmatprep.subr.bf16.mxu0 %v2527_v3  ;;  %2401 = vmatprep.subr.bf16.mxu1 %v2528_v38  ;;  %p2552_p0 = scmp.ne.s32.totalorder %s2064_s4, %s2551_s20  ;;  %p2557_p2 = scmp.lt.s32.totalorder %s2551_s20, %s2551_s20 }
 0x133   :  { %p2558_p3 = por %p2557_p2, %p2556_p1 }
 0x134   :  { %2380 = vmatpush3.bf16.msra.mxu0 %v2529_v47  ;;  %2402 = vmatpush3.bf16.msra.mxu1 %v2530_v4 }
 0x135   :  { %2381 = vmatprep.subr.bf16.mxu0 %v2531_v43  ;;  %2403 = vmatprep.subr.bf16.mxu1 %v2532_v42  ;;  %p2559_p4 = pnand %p2558_p3, %p2552_p0 }
 0x138   :  { %2382 = vmatpush3.bf16.msra.mxu0 %v2533_v6  ;;  %2404 = vmatpush3.bf16.msra.mxu1 %v2534_v44 }
 0x139   :  { %2383 = vmatprep.subr.bf16.mxu0 %v2535_v7  ;;  %2405 = vmatprep.subr.bf16.mxu1 %v2536_v9 }
 0x13c   :  { %2384 = vmatpush3.bf16.msra.mxu0 %v2537_v10  ;;  %2406 = vmatpush3.bf16.msra.mxu1 %v2538_v8 }
 0x13d   :  { %2385 = vmatprep.subr.bf16.mxu0 %v2539_v11  ;;  %2407 = vmatprep.subr.bf16.mxu1 %v2540_v13 }
 0x140   :  { %2386 = vmatpush3.bf16.msra.mxu0 %v2541_v14  ;;  %2408 = vmatpush3.bf16.msra.mxu1 %v2542_v15 }
 0x141   :  { %2387 = vmatprep.subr.bf16.mxu0 %v2543_v17  ;;  %2409 = vmatprep.subr.bf16.mxu1 %v2544_v18 }
 0x144   :  { %2388 = vmatpush3.bf16.msra.mxu0 %v2545_v19  ;;  %2410 = vmatpush3.bf16.msra.mxu1 %v2546_v20 }
 0x145   :  { %2389 = vmatprep.subr.bf16.mxu0 %v2547_v21  ;;  %2411 = vmatprep.subr.bf16.mxu1 %v2548_v22 }
 0x148   :  { %2390 = vmatpush3.bf16.msra.mxu0 %v2549_v23  ;;  %2412 = vmatpush3.bf16.msra.mxu1 %v2550_v24 }
 0x14b   :  { %2007 = vmatmul.mubr.bf16.vlgmr.msra.gmra.mrb[28].mxu0 %v2981_v12  ;;  %2048 = vmatmul.mubr.bf16.vlgmr.msra.gmra.mrb[28].mxu1 %v2988_v16 }
 0x1be   :  { %v2259_v25 = vpop.f32.mrb[16].mxu0  ;;  %v2281_v26 = vpop.f32.mrb[16].mxu1 }
 0x1bf   :  { %v2260_v28 = vpop.f32.mrb[17].mxu0  ;;  %v2282_v30 = vpop.f32.mrb[17].mxu1 }
 0x1c0   :  { %v2261_v29 = vadd.f32 %v2260_v28, %v2259_v25  ;;  %v2262_v31 = vpop.f32.mrb[18].mxu0  ;;  %v2283_v0 = vadd.f32 %v2282_v30, %v2281_v26  ;;  %v2284_v5 = vpop.f32.mrb[18].mxu1 }
 0x1c1   :  { %v2263_v32 = vpop.f32.mrb[19].mxu0  ;;  %v2285_v36 = vpop.f32.mrb[19].mxu1 }
 0x1c2   :  { %v1763_v34 = vadd.f32 %v2261_v29, %v2114_v27  ;;  %v2264_v35 = vadd.f32 %v2263_v32, %v2262_v31  ;;  %v2286_v37 = vadd.f32 %v2285_v36, %v2284_v5 }
 0x1c4   :  { %v1804_v12 = vadd.f32 %v2283_v0, %v1763_v34  ;;  %v1766_v41 = vadd.f32 %v2264_v35, %v2114_v27 }
 0x1c6   :  { %v1807_v16 = vadd.f32 %v2286_v37, %v1766_v41 }
 0x1de   :  { %v2303_v49 = vpop.f32.mrb[20].mxu0  ;;  %v2325_v45 = vpop.f32.mrb[20].mxu1 }
 0x1df   :  { %v2304_v46 = vpop.f32.mrb[21].mxu0  ;;  %v2326_v59 = vpop.f32.mrb[21].mxu1 }
 0x1e0   :  { %v2305_v51 = vadd.f32 %v2304_v46, %v2303_v49  ;;  %v2306_v39 = vpop.f32.mrb[22].mxu0  ;;  %v2327_v1 = vadd.f32 %v2326_v59, %v2325_v45  ;;  %v2328_v33 = vpop.f32.mrb[22].mxu1 }
 0x1e1   :  { %v2307_v48 = vpop.f32.mrb[23].mxu0  ;;  %v2329_v53 = vpop.f32.mrb[23].mxu1 }
 0x1e2   :  { %v1845_v50 = vadd.f32 %v2305_v51, %v1804_v12  ;;  %v2308_v52 = vadd.f32 %v2307_v48, %v2306_v39  ;;  %v2330_v54 = vadd.f32 %v2329_v53, %v2328_v33 }
 0x1e4   :  { %v1886_v55 = vadd.f32 %v2327_v1, %v1845_v50  ;;  %v1848_v56 = vadd.f32 %v2308_v52, %v1807_v16 }
 0x1e6   :  { %v1889_v57 = vadd.f32 %v2330_v54, %v1848_v56 }
 0x1fe   :  { %v2347_v58 = vpop.f32.mrb[24].mxu0  ;;  %v2369_v60 = vpop.f32.mrb[24].mxu1 }
 0x1ff   :  { %v2348_v61 = vpop.f32.mrb[25].mxu0  ;;  %v2370_v63 = vpop.f32.mrb[25].mxu1 }
 0x200   :  { %v2349_v62 = vadd.f32 %v2348_v61, %v2347_v58  ;;  %v2350_v2 = vpop.f32.mrb[26].mxu0  ;;  %v2371_v40 = vadd.f32 %v2370_v63, %v2369_v60  ;;  %v2372_v3 = vpop.f32.mrb[26].mxu1 }
 0x201   :  { %v2351_v38 = vpop.f32.mrb[27].mxu0  ;;  %v2373_v43 = vpop.f32.mrb[27].mxu1 }
 0x202   :  { %v1927_v47 = vadd.f32 %v2349_v62, %v1886_v55  ;;  %v2352_v4 = vadd.f32 %v2351_v38, %v2350_v2  ;;  %v2374_v42 = vadd.f32 %v2373_v43, %v2372_v3 }
 0x204   :  { %v1968_v6 = vadd.f32 %v2371_v40, %v1927_v47  ;;  %v1930_v44 = vadd.f32 %v2352_v4, %v1889_v57 }
 0x206   :  { %v1971_v7 = vadd.f32 %v2374_v42, %v1930_v44 }
 0x21e   :  { %v2391_v9 = vpop.f32.mrb[28].mxu0  ;;  %v2413_v10 = vpop.f32.mrb[28].mxu1 }
 0x21f   :  { %v2392_v8 = vpop.f32.mrb[29].mxu0  ;;  %v2414_v13 = vpop.f32.mrb[29].mxu1 }
 0x220   :  { %v2393_v11 = vadd.f32 %v2392_v8, %v2391_v9  ;;  %v2394_v14 = vpop.f32.mrb[30].mxu0  ;;  %v2415_v15 = vadd.f32 %v2414_v13, %v2413_v10  ;;  %v2416_v17 = vpop.f32.mrb[30].mxu1 }
 0x221   :  { %v2395_v18 = vpop.f32.mrb[31].mxu0  ;;  %v2417_v21 = vpop.f32.mrb[31].mxu1 }
 0x222   :  { %v2009_v19 = vadd.f32 %v2393_v11, %v1968_v6  ;;  %v2396_v20 = vadd.f32 %v2395_v18, %v2394_v14  ;;  %v2418_v22 = vadd.f32 %v2417_v21, %v2416_v17 }
 0x224   :  { %v2050_v23 = vadd.f32 %v2415_v15, %v2009_v19  ;;  %v2012_v24 = vadd.f32 %v2396_v20, %v1971_v7 }
 0x226   :  { %2056 = vst.msk [vmem:[#allocation2] sm:$0xff] %vm301_vm0, %v2050_v23  ;;  %v2053_v25 = vadd.f32 %v2418_v22, %v2012_v24 }
 0x228   :  { %2057 = vst.msk [vmem:[#allocation2 + $0x8] sm:$0xff] %vm301_vm0, %v2053_v25 }
 0x229   :  { %2562 = shalt.err (!%p2559_p4)
}
 0x22a   :  { %s2563_s23 = scalar_lea.hbm %s3231_s5, 256 }
 0x22b   :  { %p2564_p5 = scmp.ne.s32.totalorder %s3231_s5, %s2563_s23  ;;  %p2567_p6 = scmp.lt.u32.totalorder %s2563_s23, %s3231_s5 }
 0x22d   :  { %p2569_p7 = pnand %p2567_p6, %p2564_p5 }
 0x22f   :  { %2572 = shalt.err (!%p2569_p7)
}
 0x230   :  { %s2577_s27 = smov 128   ;;  %s2578_s28 = smov 8  }
 0x231   :  { %2069 = dma.vmem_to_hbm [thread:$0]  %s2064_s4, 256, %s3231_s5, [#allocation3], %s2577_s27, %s2577_s27, %s2578_s28  }
 0x232   :  { %2573 = dma.done.wait [#allocation3], 256  }
 0x233   :  { %2574 = vsyncadd [#allocation3], 4294967040 }
 0x234   :  { %2073 = vsyncpa [#allocation3], 1 }

</bundles_post_ra>
